<compile_context>
chip_gen: v7x
topology: tpu7x:2x2x1
jax: 0.10.0
libtpu: 0.0.40
codegen_flags: <defaults>
</compile_context>

<pallas_src>
import jax
import jax.numpy as jnp
from jax.experimental import pallas as pl
from jax.experimental.pallas import tpu as pltpu


def residual4_kernel(x_ref, w1_ref, b1_ref, w2_ref, b2_ref, o_ref):
    # x_ref : (n_blk, H, W*C) bf16 lane-dense input slabs (n_blk whole images)
    # w*_ref: (3, W*C, W*C)   bf16 block-banded conv weights (BN scale pre-folded),
    #                         one matrix per kh tap
    # b*_ref: (1, W*C)        f32 folded BN bias (per-channel, tiled over W)
    # o_ref : (n_blk, H, W*C) out_dtype
    n_blk, H, WC = x_ref.shape
    M = n_blk * H

    x_bf = x_ref[...].reshape(M, WC)              # (M, WC) bf16, free leading-dim merge
    x_f32 = x_bf.astype(jnp.float32)

    # Per-image row masks: zero the rolled-in row at each image's top / bottom edge so
    # the +-1 row shifts (SAME padding along H) never bleed across images in the slab.
    row = jax.lax.broadcasted_iota(jnp.int32, (M, WC), 0)
    row_in_img = row % H
    not_top = row_in_img != 0
    not_bot = row_in_img != (H - 1)

    def conv3x3(inp_f32, w_ref):
        # inp_f32: (M, WC) f32.  kh taps via XLU sublane rolls + boundary masks; the kw
        # taps and W-axis zero padding are encoded in the banded weight matrices.
        up = jnp.where(not_top, pltpu.roll(inp_f32, 1, 0), 0.0)        # up[r] = inp[r-1]
        down = jnp.where(not_bot, pltpu.roll(inp_f32, M - 1, 0), 0.0)  # down[r] = inp[r+1]
        acc = jnp.dot(up.astype(jnp.bfloat16), w_ref[0],
                      preferred_element_type=jnp.float32)
        acc = acc + jnp.dot(inp_f32.astype(jnp.bfloat16), w_ref[1],
                            preferred_element_type=jnp.float32)
        acc = acc + jnp.dot(down.astype(jnp.bfloat16), w_ref[2],
                            preferred_element_type=jnp.float32)
        return acc                                                     # (M, WC) f32

    # conv1 (+ folded BN1 scale) -> bias -> relu
    y = jnp.maximum(conv3x3(x_f32, w1_ref) + b1_ref[...], 0.0)

    # conv2 (+ folded BN2 scale) -> bias -> residual add -> relu
    y2 = conv3x3(y, w2_ref) + b2_ref[...]
    out = jnp.maximum(x_f32 + y2, 0.0)
    o_ref[...] = out.reshape(n_blk, H, WC).astype(o_ref.dtype)


def _banded_weights(w_hwio, W):
    """Fold the kw taps of a 3x3 HWIO conv weight into block-banded (W*Cin, W*Cout)
    matrices, one per kh tap, so conv(x) == sum_kh rowshift(x, kh-1) @ B[kh].
    Zero off-band blocks implement the W-axis zero padding."""
    _, _, Cin, Cout = w_hwio.shape
    wi = jnp.arange(W)
    kw = wi[:, None] - wi[None, :] + 1                     # tap feeding w_in -> w_out
    valid = ((kw >= 0) & (kw <= 2)).astype(w_hwio.dtype)
    kw_c = jnp.clip(kw, 0, 2)
    mats = []
    for kh in range(3):
        blocks = w_hwio[kh][kw_c] * valid[:, :, None, None]  # (W, W, Cin, Cout)
        mats.append(blocks.transpose(0, 2, 1, 3).reshape(W * Cin, W * Cout))
    return jnp.stack(mats)                                    # (3, W*Cin, W*Cout)


def prepare_residual4_params(w1, s1, b1, w2, s2, b2, W):
    """Build the banded, BN-scale-folded bf16 weights and f32 bias rows ONCE (model
    init time).  Keeping this out of the per-call path avoids rebuilding ~768 KiB of
    zero-inflated banded matrices (and the associated HBM traffic) on every forward."""
    Cout1 = w1.shape[-1]
    Cout2 = w2.shape[-1]
    # Fold BN scale (per output channel) into the conv weights in f32, then cast once.
    w1s = w1.astype(jnp.float32) * s1.astype(jnp.float32)[None, None, None, :]
    w2s = w2.astype(jnp.float32) * s2.astype(jnp.float32)[None, None, None, :]
    wb1 = _banded_weights(w1s, W).astype(jnp.bfloat16)
    wb2 = _banded_weights(w2s, W).astype(jnp.bfloat16)
    b1t = jnp.tile(b1.astype(jnp.float32), W).reshape(1, W * Cout1)
    b2t = jnp.tile(b2.astype(jnp.float32), W).reshape(1, W * Cout2)
    return wb1, b1t, wb2, b2t


def residual4_pallas(x_nhwc, params, *, out_dtype=jnp.float32, target_rows=256):
    wb1, b1t, wb2, b2t = params
    N, H, W, C = x_nhwc.shape
    WC = W * C
    assert wb1.shape == (3, WC, WC) and wb2.shape == (3, WC, WC)

    # Pack as many whole images per grid step as fit ~target_rows matmul rows
    # (v6e/v7x weight-panel amortization); n_blk must divide N.
    n_blk = max(1, min(N, max(1, target_rows // H)))
    while N % n_blk:
        n_blk -= 1
    grid = (N // n_blk,)

    x2d = x_nhwc.astype(jnp.bfloat16).reshape(N, H, WC)   # lane-dense slabs (free reshape)

    # Real banded FLOPs / bytes so XLA can schedule neighbors around this small kernel.
    cost = pl.CostEstimate(
        flops=12 * N * H * WC * WC + 12 * N * H * WC,
        transcendentals=0,
        bytes_accessed=(N * H * WC * 2                       # x (bf16)
                        + N * H * WC * jnp.dtype(out_dtype).itemsize
                        + 2 * 3 * WC * WC * 2                # banded weights (bf16)
                        + 2 * WC * 4))                       # biases (f32)

    out = pl.pallas_call(
        residual4_kernel,
        out_shape=jax.ShapeDtypeStruct((N, H, WC), out_dtype),
        grid_spec=pltpu.PrefetchScalarGridSpec(
            num_scalar_prefetch=0,
            grid=grid,
            in_specs=[
                pl.BlockSpec((n_blk, H, WC), lambda n: (n, 0, 0)),
                pl.BlockSpec((3, WC, WC), lambda n: (0, 0, 0)),
                pl.BlockSpec((1, WC), lambda n: (0, 0)),
                pl.BlockSpec((3, WC, WC), lambda n: (0, 0, 0)),
                pl.BlockSpec((1, WC), lambda n: (0, 0)),
            ],
            out_specs=pl.BlockSpec((n_blk, H, WC), lambda n: (n, 0, 0)),
        ),
        compiler_params=pltpu.CompilerParams(
            dimension_semantics=("parallel",)),
        cost_estimate=cost,
    )(x2d, wb1, b1t, wb2, b2t)

    return out.reshape(N, H, W, C)


def residual4_reference(x_nhwc, w1, s1, b1, w2, s2, b2):
    """Pure-JAX reference (matching bf16 operand rounding, f32 accumulation)."""
    dn = ('NHWC', 'HWIO', 'NHWC')
    xb = x_nhwc.astype(jnp.bfloat16)
    y = jax.lax.conv_general_dilated(xb, w1.astype(jnp.bfloat16), (1, 1), 'SAME',
                                     dimension_numbers=dn,
                                     preferred_element_type=jnp.float32)
    y = jnp.maximum(y * s1 + b1, 0.0)
    y = jax.lax.conv_general_dilated(y.astype(jnp.bfloat16), w2.astype(jnp.bfloat16),
                                     (1, 1), 'SAME', dimension_numbers=dn,
                                     preferred_element_type=jnp.float32)
    y = y * s2 + b2
    return jnp.maximum(xb.astype(jnp.float32) + y, 0.0)


if __name__ == "__main__":
    # Residual add requires in_channels == out_channels in this module.
    N, C, H, W = 2, 16, 16, 16
    eps = 1e-5

    key = jax.random.PRNGKey(0)
    kx, kw1, kw2, kg1, kb1, kg2, kb2, km1, kv1, km2, kv2 = jax.random.split(key, 11)

    # PyTorch-style NCHW input, transposed to NHWC for the kernel.
    x_nchw = jax.random.normal(kx, (N, C, H, W), jnp.float32)
    x_nhwc = jnp.transpose(x_nchw, (0, 2, 3, 1))

    # Conv weights directly in HWIO (3, 3, Cin, Cout); PyTorch's (Cout, Cin, 3, 3)
    # would be transposed with (2, 3, 1, 0).
    w1 = jax.random.normal(kw1, (3, 3, C, C), jnp.float32) * 0.05
    w2 = jax.random.normal(kw2, (3, 3, C, C), jnp.float32) * 0.05

    # BatchNorm parameters, folded into scale/bias (inference mode).
    gamma1 = 1.0 + 0.1 * jax.random.normal(kg1, (C,), jnp.float32)
    beta1 = 0.1 * jax.random.normal(kb1, (C,), jnp.float32)
    mean1 = 0.1 * jax.random.normal(km1, (C,), jnp.float32)
    var1 = jnp.abs(jax.random.normal(kv1, (C,), jnp.float32)) + 0.5
    gamma2 = 1.0 + 0.1 * jax.random.normal(kg2, (C,), jnp.float32)
    beta2 = 0.1 * jax.random.normal(kb2, (C,), jnp.float32)
    mean2 = 0.1 * jax.random.normal(km2, (C,), jnp.float32)
    var2 = jnp.abs(jax.random.normal(kv2, (C,), jnp.float32)) + 0.5

    s1 = gamma1 / jnp.sqrt(var1 + eps)
    b1 = beta1 - mean1 * s1
    s2 = gamma2 / jnp.sqrt(var2 + eps)
    b2 = beta2 - mean2 * s2

    # Built once (model init), reused for every forward call.
    params = prepare_residual4_params(w1, s1, b1, w2, s2, b2, W)
    params = jax.block_until_ready(params)

    out = residual4_pallas(x_nhwc, params)
    out = jax.block_until_ready(out)

    ref = residual4_reference(x_nhwc, w1, s1, b1, w2, s2, b2)
    assert out.shape == (N, H, W, C)
    # bf16 matmul operands (with BN scale folded before the bf16 cast) -> loose tolerance.
    assert jnp.allclose(out, ref, rtol=2e-2, atol=2e-2), "mismatch vs reference"

    print("KERNEL_OK")
</pallas_src>

<mosaic_0001>
module attributes {stable_mosaic.version = 11 : i64} {
  func.func @residual4_kernel(%arg0: i32, %arg1: memref<2x16x256xbf16, #tpu.memory_space<vmem>>, %arg2: memref<3x256x256xbf16, #tpu.memory_space<vmem>>, %arg3: memref<1x256xf32, #tpu.memory_space<vmem>>, %arg4: memref<3x256x256xbf16, #tpu.memory_space<vmem>>, %arg5: memref<1x256xf32, #tpu.memory_space<vmem>>, %arg6: memref<2x16x256xf32, #tpu.memory_space<vmem>>) attributes {dimension_semantics = [#tpu.dimension_semantics<parallel>], iteration_bounds = array<i64: 1>, scalar_prefetch = 0 : i64, scratch_operands = 0 : i64, tpu.core_type = #tpu.core_type<tc>, window_params = [{transform_indices = @transform_0, window_bounds = array<i64: 2, 16, 256>}, {pipeline_mode = #tpu.pipeline_mode<synchronous>, transform_indices = @transform_1, window_bounds = array<i64: 3, 256, 256>}, {pipeline_mode = #tpu.pipeline_mode<synchronous>, transform_indices = @transform_2, window_bounds = array<i64: 1, 256>}, {pipeline_mode = #tpu.pipeline_mode<synchronous>, transform_indices = @transform_3, window_bounds = array<i64: 3, 256, 256>}, {pipeline_mode = #tpu.pipeline_mode<synchronous>, transform_indices = @transform_4, window_bounds = array<i64: 1, 256>}, {transform_indices = @transform_5, window_bounds = array<i64: 2, 16, 256>}]} {
    %c0 = arith.constant 0 : index
    %c0_0 = arith.constant 0 : index
    %c0_1 = arith.constant 0 : index
    %0 = vector.load %arg1[%c0, %c0_0, %c0_1] : memref<2x16x256xbf16, #tpu.memory_space<vmem>>, vector<2x16x256xbf16>
    %1 = vector.shape_cast %0 : vector<2x16x256xbf16> to vector<32x256xbf16>
    %2 = arith.extf %1 : vector<32x256xbf16> to vector<32x256xf32>
    %3 = tpu.iota {dimensions = array<i32: 0>} : vector<32x256xi32>
    %c16_i32 = arith.constant 16 : i32
    %c0_i32 = arith.constant 0 : i32
    %4 = arith.cmpi eq, %c16_i32, %c0_i32 : i32
    %c1_i32 = arith.constant 1 : i32
    %5 = arith.select %4, %c1_i32, %c16_i32 : i32
    %6 = vector.broadcast %5 : i32 to vector<32x256xi32>
    %7 = arith.remsi %3, %6 : vector<32x256xi32>
    %c0_i32_2 = arith.constant 0 : i32
    %8 = vector.broadcast %c0_i32_2 : i32 to vector<32x256xi32>
    %9 = arith.cmpi ne, %7, %8 : vector<32x256xi32>
    %c0_i32_3 = arith.constant 0 : i32
    %10 = vector.broadcast %c0_i32_3 : i32 to vector<32x256xi32>
    %11 = arith.cmpi slt, %7, %10 : vector<32x256xi32>
    %c0_i32_4 = arith.constant 0 : i32
    %12 = arith.cmpi slt, %5, %c0_i32_4 : i32
    %13 = vector.broadcast %12 : i1 to vector<32x256xi1>
    %14 = vector.broadcast %13 : vector<32x256xi1> to vector<32x256xi1>
    %15 = arith.xori %11, %14 : vector<32x256xi1>
    %16 = arith.andi %15, %9 : vector<32x256xi1>
    %17 = vector.broadcast %5 : i32 to vector<32x256xi32>
    %18 = arith.addi %7, %17 : vector<32x256xi32>
    %19 = arith.select %16, %18, %7 : vector<32x256xi1>, vector<32x256xi32>
    %c0_i32_5 = arith.constant 0 : i32
    %20 = vector.broadcast %c0_i32_5 : i32 to vector<32x256xi32>
    %21 = arith.cmpi ne, %19, %20 : vector<32x256xi32>
    %c15_i32 = arith.constant 15 : i32
    %22 = vector.broadcast %c15_i32 : i32 to vector<32x256xi32>
    %23 = arith.cmpi ne, %19, %22 : vector<32x256xi32>
    %c1_i32_6 = arith.constant 1 : i32
    %24 = tpu.dynamic_rotate %2 by %c1_i32_6 dim 0 : vector<32x256xf32>, i32 -> vector<32x256xf32>
    %cst = arith.constant 0.000000e+00 : f32
    %25 = vector.broadcast %cst : f32 to vector<32x256xf32>
    %26 = arith.select %21, %24, %25 : vector<32x256xi1>, vector<32x256xf32>
    %c31_i32 = arith.constant 31 : i32
    %27 = tpu.dynamic_rotate %2 by %c31_i32 dim 0 : vector<32x256xf32>, i32 -> vector<32x256xf32>
    %cst_7 = arith.constant 0.000000e+00 : f32
    %28 = vector.broadcast %cst_7 : f32 to vector<32x256xf32>
    %29 = arith.select %23, %27, %28 : vector<32x256xi1>, vector<32x256xf32>
    %30 = arith.truncf %26 : vector<32x256xf32> to vector<32x256xbf16>
    %c0_8 = arith.constant 0 : index
    %c0_9 = arith.constant 0 : index
    %c0_10 = arith.constant 0 : index
    %31 = vector.load %arg2[%c0_8, %c0_9, %c0_10] : memref<3x256x256xbf16, #tpu.memory_space<vmem>>, vector<1x256x256xbf16>
    %32 = vector.shape_cast %31 : vector<1x256x256xbf16> to vector<256x256xbf16>
    %cst_11 = arith.constant dense<0.000000e+00> : vector<32x256xf32>
    %33 = tpu.matmul %30, %32, %cst_11 {dimension_numbers = #tpu.dot_dimension_numbers<[1], [0], [0], [1], [0, 0, 1, 1], [], []>} : vector<32x256xbf16>, vector<256x256xbf16>, vector<32x256xf32> -> vector<32x256xf32>
    %34 = arith.truncf %2 : vector<32x256xf32> to vector<32x256xbf16>
    %c1 = arith.constant 1 : index
    %c0_12 = arith.constant 0 : index
    %c0_13 = arith.constant 0 : index
    %35 = vector.load %arg2[%c1, %c0_12, %c0_13] : memref<3x256x256xbf16, #tpu.memory_space<vmem>>, vector<1x256x256xbf16>
    %36 = vector.shape_cast %35 : vector<1x256x256xbf16> to vector<256x256xbf16>
    %cst_14 = arith.constant dense<0.000000e+00> : vector<32x256xf32>
    %37 = tpu.matmul %34, %36, %cst_14 {dimension_numbers = #tpu.dot_dimension_numbers<[1], [0], [0], [1], [0, 0, 1, 1], [], []>} : vector<32x256xbf16>, vector<256x256xbf16>, vector<32x256xf32> -> vector<32x256xf32>
    %38 = arith.addf %33, %37 : vector<32x256xf32>
    %39 = arith.truncf %29 : vector<32x256xf32> to vector<32x256xbf16>
    %c2 = arith.constant 2 : index
    %c0_15 = arith.constant 0 : index
    %c0_16 = arith.constant 0 : index
    %40 = vector.load %arg2[%c2, %c0_15, %c0_16] : memref<3x256x256xbf16, #tpu.memory_space<vmem>>, vector<1x256x256xbf16>
    %41 = vector.shape_cast %40 : vector<1x256x256xbf16> to vector<256x256xbf16>
    %cst_17 = arith.constant dense<0.000000e+00> : vector<32x256xf32>
    %42 = tpu.matmul %39, %41, %cst_17 {dimension_numbers = #tpu.dot_dimension_numbers<[1], [0], [0], [1], [0, 0, 1, 1], [], []>} : vector<32x256xbf16>, vector<256x256xbf16>, vector<32x256xf32> -> vector<32x256xf32>
    %43 = arith.addf %38, %42 : vector<32x256xf32>
    %c0_18 = arith.constant 0 : index
    %c0_19 = arith.constant 0 : index
    %44 = vector.load %arg3[%c0_18, %c0_19] : memref<1x256xf32, #tpu.memory_space<vmem>>, vector<1x256xf32>
    %45 = vector.broadcast %44 : vector<1x256xf32> to vector<32x256xf32>
    %46 = arith.addf %43, %45 : vector<32x256xf32>
    %cst_20 = arith.constant 0.000000e+00 : f32
    %47 = vector.broadcast %cst_20 : f32 to vector<32x256xf32>
    %48 = arith.maximumf %46, %47 : vector<32x256xf32>
    %c1_i32_21 = arith.constant 1 : i32
    %49 = tpu.dynamic_rotate %48 by %c1_i32_21 dim 0 : vector<32x256xf32>, i32 -> vector<32x256xf32>
    %cst_22 = arith.constant 0.000000e+00 : f32
    %50 = vector.broadcast %cst_22 : f32 to vector<32x256xf32>
    %51 = arith.select %21, %49, %50 : vector<32x256xi1>, vector<32x256xf32>
    %c31_i32_23 = arith.constant 31 : i32
    %52 = tpu.dynamic_rotate %48 by %c31_i32_23 dim 0 : vector<32x256xf32>, i32 -> vector<32x256xf32>
    %cst_24 = arith.constant 0.000000e+00 : f32
    %53 = vector.broadcast %cst_24 : f32 to vector<32x256xf32>
    %54 = arith.select %23, %52, %53 : vector<32x256xi1>, vector<32x256xf32>
    %55 = arith.truncf %51 : vector<32x256xf32> to vector<32x256xbf16>
    %c0_25 = arith.constant 0 : index
    %c0_26 = arith.constant 0 : index
    %c0_27 = arith.constant 0 : index
    %56 = vector.load %arg4[%c0_25, %c0_26, %c0_27] : memref<3x256x256xbf16, #tpu.memory_space<vmem>>, vector<1x256x256xbf16>
    %57 = vector.shape_cast %56 : vector<1x256x256xbf16> to vector<256x256xbf16>
    %cst_28 = arith.constant dense<0.000000e+00> : vector<32x256xf32>
    %58 = tpu.matmul %55, %57, %cst_28 {dimension_numbers = #tpu.dot_dimension_numbers<[1], [0], [0], [1], [0, 0, 1, 1], [], []>} : vector<32x256xbf16>, vector<256x256xbf16>, vector<32x256xf32> -> vector<32x256xf32>
    %59 = arith.truncf %48 : vector<32x256xf32> to vector<32x256xbf16>
    %c1_29 = arith.constant 1 : index
    %c0_30 = arith.constant 0 : index
    %c0_31 = arith.constant 0 : index
    %60 = vector.load %arg4[%c1_29, %c0_30, %c0_31] : memref<3x256x256xbf16, #tpu.memory_space<vmem>>, vector<1x256x256xbf16>
    %61 = vector.shape_cast %60 : vector<1x256x256xbf16> to vector<256x256xbf16>
    %cst_32 = arith.constant dense<0.000000e+00> : vector<32x256xf32>
    %62 = tpu.matmul %59, %61, %cst_32 {dimension_numbers = #tpu.dot_dimension_numbers<[1], [0], [0], [1], [0, 0, 1, 1], [], []>} : vector<32x256xbf16>, vector<256x256xbf16>, vector<32x256xf32> -> vector<32x256xf32>
    %63 = arith.addf %58, %62 : vector<32x256xf32>
    %64 = arith.truncf %54 : vector<32x256xf32> to vector<32x256xbf16>
    %c2_33 = arith.constant 2 : index
    %c0_34 = arith.constant 0 : index
    %c0_35 = arith.constant 0 : index
    %65 = vector.load %arg4[%c2_33, %c0_34, %c0_35] : memref<3x256x256xbf16, #tpu.memory_space<vmem>>, vector<1x256x256xbf16>
    %66 = vector.shape_cast %65 : vector<1x256x256xbf16> to vector<256x256xbf16>
    %cst_36 = arith.constant dense<0.000000e+00> : vector<32x256xf32>
    %67 = tpu.matmul %64, %66, %cst_36 {dimension_numbers = #tpu.dot_dimension_numbers<[1], [0], [0], [1], [0, 0, 1, 1], [], []>} : vector<32x256xbf16>, vector<256x256xbf16>, vector<32x256xf32> -> vector<32x256xf32>
    %68 = arith.addf %63, %67 : vector<32x256xf32>
    %c0_37 = arith.constant 0 : index
    %c0_38 = arith.constant 0 : index
    %69 = vector.load %arg5[%c0_37, %c0_38] : memref<1x256xf32, #tpu.memory_space<vmem>>, vector<1x256xf32>
    %70 = vector.broadcast %69 : vector<1x256xf32> to vector<32x256xf32>
    %71 = arith.addf %68, %70 : vector<32x256xf32>
    %72 = arith.addf %2, %71 : vector<32x256xf32>
    %cst_39 = arith.constant 0.000000e+00 : f32
    %73 = vector.broadcast %cst_39 : f32 to vector<32x256xf32>
    %74 = arith.maximumf %72, %73 : vector<32x256xf32>
    %75 = vector.shape_cast %74 : vector<32x256xf32> to vector<2x16x256xf32>
    %c0_40 = arith.constant 0 : index
    %c0_41 = arith.constant 0 : index
    %c0_42 = arith.constant 0 : index
    %76 = vector.load %arg6[%c0_40, %c0_41, %c0_42] : memref<2x16x256xf32, #tpu.memory_space<vmem>>, vector<2x16x256xf32>
    tpu.vector_store %arg6[%c0_40, %c0_41, %c0_42], %75 {strides = array<i32>} : memref<2x16x256xf32, #tpu.memory_space<vmem>>, vector<2x16x256xf32>,
    return
  }
  func.func @transform_0(%arg0: i32) -> (i32, i32, i32) {
    %c0_i32 = arith.constant 0 : i32
    %c0_i32_0 = arith.constant 0 : i32
    %c0_i32_1 = arith.constant 0 : i32
    return %arg0, %c0_i32, %c0_i32_0 : i32, i32, i32
  }
  func.func @transform_1(%arg0: i32) -> (i32, i32, i32) {
    %c0_i32 = arith.constant 0 : i32
    %c0_i32_0 = arith.constant 0 : i32
    %c0_i32_1 = arith.constant 0 : i32
    %c0_i32_2 = arith.constant 0 : i32
    return %c0_i32, %c0_i32_0, %c0_i32_1 : i32, i32, i32
  }
  func.func @transform_2(%arg0: i32) -> (i32, i32) {
    %c0_i32 = arith.constant 0 : i32
    %c0_i32_0 = arith.constant 0 : i32
    %c0_i32_1 = arith.constant 0 : i32
    return %c0_i32, %c0_i32_0 : i32, i32
  }
  func.func @transform_3(%arg0: i32) -> (i32, i32, i32) {
    %c0_i32 = arith.constant 0 : i32
    %c0_i32_0 = arith.constant 0 : i32
    %c0_i32_1 = arith.constant 0 : i32
    %c0_i32_2 = arith.constant 0 : i32
    return %c0_i32, %c0_i32_0, %c0_i32_1 : i32, i32, i32
  }
  func.func @transform_4(%arg0: i32) -> (i32, i32) {
    %c0_i32 = arith.constant 0 : i32
    %c0_i32_0 = arith.constant 0 : i32
    %c0_i32_1 = arith.constant 0 : i32
    return %c0_i32, %c0_i32_0 : i32, i32
  }
  func.func @transform_5(%arg0: i32) -> (i32, i32, i32) {
    %c0_i32 = arith.constant 0 : i32
    %c0_i32_0 = arith.constant 0 : i32
    %c0_i32_1 = arith.constant 0 : i32
    return %arg0, %c0_i32, %c0_i32_0 : i32, i32, i32
  }
}

</mosaic_0001>

<bundles_post_ra>
// kernel: tpu_custom_call.1
= control target key start
LH: loop header
LB: loop body
LE: loop exit
PB: predicated region body
PF: predicated region fallthrough
CT: control target
= control target key end

     0   :  { %10 = vsyncpa [#allocation3], 0  ;;  %s2929_s0 = inlined_call_operand.hbm [shape: bf16[2,16,256], index: 0, kind: input, shape index: {}]   ;;  %s2930_s1 = inlined_call_operand.hbm [shape: bf16[3,256,256], index: 1, kind: input, shape index: {}]   ;;  %s2931_s2 = inlined_call_operand.vmem [shape: f32[1,256], index: 2, kind: input, shape index: {}]   ;;  %s2932_s3 = inlined_call_operand.hbm [shape: bf16[3,256,256], index: 3, kind: input, shape index: {}]   ;;  %s2933_s4 = inlined_call_operand.vmem [shape: f32[1,256], index: 4, kind: input, shape index: {}]   ;;  %s2934_s5 = inlined_call_operand.hbm [shape: f32[2,16,256], index: 5, kind: output, shape index: {}]  }
   0x1   :  { %11 = vsyncpa [#allocation6], 0 }
   0x2   :  { %12 = vsyncpa [#allocation4], 0  ;;  %s2524_s18 = smov [#allocation5]   ;;  %s2525_s20 = smov [#allocation2]  }
   0x3   :  { %s30_s19 = sshll.u32 %s2524_s18, 4  ;;  %s18_s21 = sshll.u32 %s2525_s20, 4  ;;  %s31_s19 = int_to_ptr.vmem [resolvable:$true] %s30_s19  ;;  %s2563_s21 = int_to_ptr.vmem [resolvable:$true] %s18_s21 }
   0x4   :  { %s2430_s24 = scalar_lea.hbm %s2930_s1, 12288 }
   0x5   :  { %p2431_p0 = scmp.ne.s32.totalorder %s2930_s1, %s2430_s24  ;;  %p2434_p1 = scmp.lt.u32.totalorder %s2430_s24, %s2930_s1 }
   0x7   :  { %p2436_p2 = pnand %p2434_p1, %p2431_p0 }
   0x9   :  { %2439 = shalt.err (!%p2436_p2)
}
   0xa   :  { %s2440_s29 = scalar_lea.vmem %s31_s19, 12288  ;;  %p2445_p4 = scmp.lt.s32.totalorder %s31_s19, %s31_s19 }
   0xb   :  { %p2441_p3 = scmp.ne.s32.totalorder %s31_s19, %s2440_s29  ;;  %p2446_p5 = scmp.lt.s32.totalorder %s2440_s29, %s2440_s29 }
   0xd   :  { %p2447_p6 = por %p2446_p5, %p2445_p4 }
   0xf   :  { %p2448_p7 = pnand %p2447_p6, %p2441_p3 }
  0x11   :  { %2451 = shalt.err (!%p2448_p7)
}
  0x12   :  { %s2526_s30 = smov 128   ;;  %s2527_s6 = smov 8  }
  0x13   :  { %36 = dma.hbm_to_vmem [thread:$0]  %s2930_s1, 12288, %s31_s19, [#allocation6], %s2526_s30, %s2526_s30, %s2527_s6  }
  0x14   :  { %s2452_s11 = scalar_lea.hbm %s2929_s0, 512 }
  0x15   :  { %p2453_p8 = scmp.ne.s32.totalorder %s2929_s0, %s2452_s11  ;;  %p2456_p9 = scmp.lt.u32.totalorder %s2452_s11, %s2929_s0 }
  0x17   :  { %p2458_p10 = pnand %p2456_p9, %p2453_p8 }
  0x19   :  { %2461 = shalt.err (!%p2458_p10)
}
  0x1a   :  { %s2462_s16 = scalar_lea.vmem %s2563_s21, 512  ;;  %p2467_p12 = scmp.lt.s32.totalorder %s2563_s21, %s2563_s21 }
  0x1b   :  { %p2463_p11 = scmp.ne.s32.totalorder %s2563_s21, %s2462_s16  ;;  %p2468_p13 = scmp.lt.s32.totalorder %s2462_s16, %s2462_s16 }
  0x1d   :  { %p2469_p0 = por %p2468_p13, %p2467_p12 }
  0x1f   :  { %p2470_p1 = pnand %p2469_p0, %p2463_p11 }
  0x21   :  { %2473 = shalt.err (!%p2470_p1)
}
  0x22   :  { %24 = dma.hbm_to_vmem [thread:$0]  %s2929_s0, 512, %s2563_s21, [#allocation3], %s2526_s30, %s2526_s30, %s2527_s6  }
  0x23   :  { %s2528_s18 = smov [#allocation7]   ;;  %s2474_s23 = scalar_lea.hbm %s2932_s3, 12288 }
  0x24   :  { %s44_s19 = sshll.u32 %s2528_s18, 4  ;;  %p2475_p2 = scmp.ne.s32.totalorder %s2932_s3, %s2474_s23  ;;  %s45_s19 = int_to_ptr.vmem [resolvable:$true] %s44_s19 }
  0x25   :  { %p2478_p3 = scmp.lt.u32.totalorder %s2474_s23, %s2932_s3 }
  0x27   :  { %p2480_p4 = pnand %p2478_p3, %p2475_p2 }
  0x29   :  { %2483 = shalt.err (!%p2480_p4)
}
  0x2a   :  { %s2484_s28 = scalar_lea.vmem %s45_s19, 12288  ;;  %p2489_p6 = scmp.lt.s32.totalorder %s45_s19, %s45_s19 }
  0x2b   :  { %p2485_p5 = scmp.ne.s32.totalorder %s45_s19, %s2484_s28  ;;  %p2490_p7 = scmp.lt.s32.totalorder %s2484_s28, %s2484_s28 }
  0x2d   :  { %p2491_p8 = por %p2490_p7, %p2489_p6 }
  0x2f   :  { %p2492_p9 = pnand %p2491_p8, %p2485_p5 }
  0x31   :  { %2495 = shalt.err (!%p2492_p9)
}
  0x32   :  { %50 = dma.hbm_to_vmem [thread:$0]  %s2932_s3, 12288, %s45_s19, [#allocation6], %s2526_s30, %s2526_s30, %s2527_s6  }
  0x33   :  { %2518 = dma.done.wait [#allocation3], 512  }
  0x34   :  { %2519 = vsyncadd [#allocation3], 4294966784 }
  0x35   :  { %2520 = dma.done.wait [#allocation6], 24576  }
  0x36   :  { %2521 = vsyncadd [#allocation6], 4294942720  ;;  %v2138_v0 = vld [vmem:[#allocation5 + $0x104] ss:$8 sps:$4 sm:$0xff]   ;;  %v2140_v1 = vld [vmem:[#allocation5 + $0x100] ss:$8 sps:$4 sm:$0xff]   ;;  %v74_v31 = vlaneseq }
  0x37   :  { %434 = vmatprep.subr.bf16.mxu0 %v2138_v0  ;;  %v2141_v2 = vld [vmem:[#allocation5 + $0x114] ss:$8 sps:$4 sm:$0xff]   ;;  %v2143_v3 = vld [vmem:[#allocation5 + $0x110] ss:$8 sps:$4 sm:$0xff]   ;;  %v2144_v4 = vld [vmem:[#allocation5 + $0x124] ss:$8 sps:$4 sm:$0xff]  }
  0x38   :  { %435 = vmatpush1.bf16.msra.mxu0 %v2140_v1  ;;  %v2146_v5 = vld [vmem:[#allocation5 + $0x120] ss:$8 sps:$4 sm:$0xff]   ;;  %v2147_v6 = vld [vmem:[#allocation5 + $0x134] ss:$8 sps:$4 sm:$0xff]   ;;  %v2149_v7 = vld [vmem:[#allocation5 + $0x130] ss:$8 sps:$4 sm:$0xff]  }
  0x39   :  { %436 = vmatprep.subr.bf16.mxu0 %v2141_v2  ;;  %v2150_v8 = vld [vmem:[#allocation5 + $0x144] ss:$8 sps:$4 sm:$0xff]   ;;  %v2152_v9 = vld [vmem:[#allocation5 + $0x140] ss:$8 sps:$4 sm:$0xff]   ;;  %v2153_v10 = vld [vmem:[#allocation5 + $0x154] ss:$8 sps:$4 sm:$0xff]  }
  0x3a   :  { %v2155_v11 = vld [vmem:[#allocation5 + $0x150] ss:$8 sps:$4 sm:$0xff]   ;;  %v2156_v12 = vld [vmem:[#allocation5 + $0x164] ss:$8 sps:$4 sm:$0xff]   ;;  %v2158_v15 = vld [vmem:[#allocation5 + $0x160] ss:$8 sps:$4 sm:$0xff]  }
  0x3b   :  { %v2615_v13 = vld [vmem:[#allocation2] sm:$0xff]  ;;  %v2617_v14 = vld [vmem:[#allocation2 + $0x8] sm:$0xff]  ;;  %v2159_v17 = vld [vmem:[#allocation5 + $0x174] ss:$8 sps:$4 sm:$0xff]   ;;  %v2621_v34 = vshrl.u32 %v74_v31, 7  ;;  %vm2529_vm2 = vmmov 1  }
  0x3c   :  { %437 = vmatpush1.bf16.msra.mxu0 %v2143_v3  ;;  %v1854_v16 = vcombine.high %v2615_v13, %v2617_v14  ;;  %v2161_v18 = vld [vmem:[#allocation5 + $0x170] ss:$8 sps:$4 sm:$0xff]   ;;  %v2162_v19 = vld [vmem:[#allocation5 + $0x184] ss:$8 sps:$4 sm:$0xff]   ;;  %v2164_v20 = vld [vmem:[#allocation5 + $0x180] ss:$8 sps:$4 sm:$0xff]   ;;  %v2627_v40 = vunpack.c.h.bf16 %v2615_v13  ;;  %v2630_v41 = vunpack.c.h.bf16 %v2617_v14  ;;  %v1853_v44 = vcombine.low %v2615_v13, %v2617_v14 }
  0x3d   :  { %438 = vmatprep.subr.bf16.mxu0 %v2144_v4  ;;  %v2165_v21 = vld [vmem:[#allocation5 + $0x194] ss:$8 sps:$4 sm:$0xff]   ;;  %v2167_v22 = vld [vmem:[#allocation5 + $0x190] ss:$8 sps:$4 sm:$0xff]   ;;  %v2168_v23 = vld [vmem:[#allocation5 + $0x1a4] ss:$8 sps:$4 sm:$0xff]  }
  0x3e   :  { %466 = vmatprep.mubr.bf16.mxu0 %v1854_v16  ;;  %v2170_v24 = vld [vmem:[#allocation5 + $0x1a0] ss:$8 sps:$4 sm:$0xff]   ;;  %v2171_v25 = vld [vmem:[#allocation5 + $0x1b4] ss:$8 sps:$4 sm:$0xff]   ;;  %v2173_v26 = vld [vmem:[#allocation5 + $0x1b0] ss:$8 sps:$4 sm:$0xff]  }
  0x3f   :  { %v2174_v27 = vld [vmem:[#allocation5 + $0x1c4] ss:$8 sps:$4 sm:$0xff]   ;;  %v2176_v28 = vld [vmem:[#allocation5 + $0x1c0] ss:$8 sps:$4 sm:$0xff]   ;;  %v2177_v29 = vld [vmem:[#allocation5 + $0x1d4] ss:$8 sps:$4 sm:$0xff]  }
  0x40   :  { %439 = vmatpush1.bf16.msra.mxu0 %v2146_v5  ;;  %v2179_v30 = vld [vmem:[#allocation5 + $0x1d0] ss:$8 sps:$4 sm:$0xff]   ;;  %v2180_v32 = vld [vmem:[#allocation5 + $0x1e4] ss:$8 sps:$4 sm:$0xff]   ;;  %v2182_v33 = vld [vmem:[#allocation5 + $0x1e0] ss:$8 sps:$4 sm:$0xff]  }
  0x41   :  { %440 = vmatprep.subr.bf16.mxu0 %v2147_v6  ;;  %v2183_v35 = vld [vmem:[#allocation5 + $0x1f4] ss:$8 sps:$4 sm:$0xff]   ;;  %v2185_v36 = vld [vmem:[#allocation5 + $0x1f0] ss:$8 sps:$4 sm:$0xff]   ;;  %v2189_v37 = vld [vmem:[#allocation5 + $0x4] ss:$8 sps:$4 sm:$0xff]  }
  0x42   :  { %v2623_v38 = vld [vmem:[#allocation2 + $0x18] sm:$0xff]  ;;  %v83_v39 = vand.u32 15, %v2621_v34  ;;  %v2632_v42 = vld [vmem:[#allocation2 + $0x10] sm:$0xff]  ;;  %v2187_v45 = vld [vmem:[#allocation5] ss:$8 sps:$4 sm:$0xff]   ;;  %v136_v47 = vrot.slane %v2627_v40, 7 }
  0x43   :  { %v2635_v43 = vunpack.c.h.bf16 %v2623_v38  ;;  %v1856_v46 = vcombine.high %v2632_v42, %v2623_v38  ;;  %v138_v48 = vrot.slane %v2630_v41, 7  ;;  %v2193_v49 = vld [vmem:[#allocation5 + $0x14] ss:$8 sps:$4 sm:$0xff]   ;;  %vm143_vm1 = vcmp.lt.s32.totalorder %v2621_v34, 1  ;;  %v2191_v51 = vld [vmem:[#allocation5 + $0x10] ss:$8 sps:$4 sm:$0xff]  }
  0x44   :  { %441 = vmatpush1.bf16.msra.mxu0 %v2149_v7  ;;  %vm127_vm0 = vcmp.ne.s32.totalorder %v83_v39, 0  ;;  %v2196_v52 = vld [vmem:[#allocation5 + $0x24] ss:$8 sps:$4 sm:$0xff]   ;;  %v2194_v56 = vld [vmem:[#allocation5 + $0x20] ss:$8 sps:$4 sm:$0xff]   ;;  %v1855_v57 = vcombine.low %v2632_v42, %v2623_v38  ;;  %vm168_vm6 = vcmp.lt.s32.totalorder %v2621_v34, 7 }
  0x45   :  { %442 = vmatprep.subr.bf16.mxu0 %v2150_v8  ;;  %v142_v50 = vrot.slane %v2635_v43, 7  ;;  %vm2646_vm3 = vmpackc.low %vm2529_vm2, %vm127_vm0  ;;  %v149_v54 = vsel %vm143_vm1, %v136_v47, %v138_v48  ;;  %v2199_v58 = vld [vmem:[#allocation5 + $0x34] ss:$8 sps:$4 sm:$0xff]   ;;  %v2286_v60 = vld [vmem:[#allocation7 + $0x104] ss:$8 sps:$4 sm:$0xff]  }
  0x46   :  { %v2288_v61 = vld [vmem:[#allocation7 + $0x100] ss:$8 sps:$4 sm:$0xff]   ;;  %v2289_v62 = vld [vmem:[#allocation7 + $0x114] ss:$8 sps:$4 sm:$0xff]   ;;  %v2197_v63 = vld [vmem:[#allocation5 + $0x30] ss:$8 sps:$4 sm:$0xff]   ;;  %1267 = vmatprep.subr.bf16.mxu1 %v2286_v60 }
  0x47   :  { %v151_v55 = vsel %vm143_vm1, %v142_v50, %v136_v47  ;;  %v2202_v0 = vld [vmem:[#allocation5 + $0x44] ss:$8 sps:$4 sm:$0xff]   ;;  %1268 = vmatpush1.bf16.msra.mxu1 %v2288_v61  ;;  %v2291_v1 = vld [vmem:[#allocation7 + $0x110] ss:$8 sps:$4 sm:$0xff]   ;;  %v2200_v3 = vld [vmem:[#allocation5 + $0x40] ss:$8 sps:$4 sm:$0xff]   ;;  %v2663_v47 = vunpack.c.l.bf16 %v2615_v13 }
  0x48   :  { %443 = vmatpush1.bf16.msra.mxu0 %v2152_v9  ;;  %v1922_v59 = vpack.c.bf16 %v149_v54, %v151_v55  ;;  %1269 = vmatprep.subr.bf16.mxu1 %v2289_v62  ;;  %v2292_v2 = vld [vmem:[#allocation7 + $0x124] ss:$8 sps:$4 sm:$0xff]   ;;  %v2205_v4 = vld [vmem:[#allocation5 + $0x54] ss:$8 sps:$4 sm:$0xff]   ;;  %v2294_v5 = vld [vmem:[#allocation7 + $0x120] ss:$8 sps:$4 sm:$0xff]   ;;  %v2672_v54 = vunpack.c.h.bf16 %v2632_v42 }
  0x49   :  { %444 = vmatprep.subr.bf16.mxu0 %v2153_v10  ;;  %v2295_v6 = vld [vmem:[#allocation7 + $0x134] ss:$8 sps:$4 sm:$0xff]   ;;  %v2203_v7 = vld [vmem:[#allocation5 + $0x50] ss:$8 sps:$4 sm:$0xff]   ;;  %v2208_v8 = vld [vmem:[#allocation5 + $0x64] ss:$8 sps:$4 sm:$0xff]  }
  0x4a   :  { %v2206_v9 = vld [vmem:[#allocation5 + $0x60] ss:$8 sps:$4 sm:$0xff]   ;;  %v2297_v10 = vld [vmem:[#allocation7 + $0x130] ss:$8 sps:$4 sm:$0xff]   ;;  %v2301_v16 = vld [vmem:[#allocation7 + $0x154] ss:$8 sps:$4 sm:$0xff]  }
  0x4b   :  { %1270 = vmatpush1.bf16.msra.mxu1 %v2291_v1  ;;  %v2312_v31 = vld [vmem:[#allocation7 + $0x180] ss:$8 sps:$4 sm:$0xff]   ;;  %v2233_v55 = vld [vmem:[#allocation5 + $0xe4] ss:$8 sps:$4 sm:$0xff]   ;;  %v2237_v60 = vld [vmem:[#allocation5 + $0xf4] ss:$8 sps:$4 sm:$0xff]  }
  0x4c   :  { %445 = vmatpush1.bf16.msra.mxu0 %v2155_v11  ;;  %1271 = vmatprep.subr.bf16.mxu1 %v2292_v2  ;;  %v2211_v11 = vld [vmem:[#allocation5 + $0x74] ss:$8 sps:$4 sm:$0xff]   ;;  %v2224_v39 = vld [vmem:[#allocation5 + $0xc0] ss:$8 sps:$4 sm:$0xff]   ;;  %v2322_v13 = vld [vmem:[#allocation7 + $0x1c4] ss:$8 sps:$4 sm:$0xff]   ;;  %v2682_v2 = vunpack.c.l.bf16 %v2632_v42 }
  0x4d   :  { %446 = vmatprep.subr.bf16.mxu0 %v2156_v12  ;;  %v2298_v12 = vld [vmem:[#allocation7 + $0x144] ss:$8 sps:$4 sm:$0xff]   ;;  %v140_v61 = vrot.slane %v2672_v54, 7  ;;  %v76_v42 = vadd.s32 8, %v2621_v34  ;;  %v2391_v53 = vld [vmem:[#allocation7 + $0x230] ss:$8 sps:$4 sm:$0xff]  }
  0x4f   :  { %1272 = vmatpush1.bf16.msra.mxu1 %v2294_v5  ;;  %v2240_v5 = vld [vmem:[#allocation5 + $0x204] ss:$8 sps:$4 sm:$0xff]  }
  0x50   :  { %447 = vmatpush1.bf16.msra.mxu0 %v2158_v15  ;;  %1273 = vmatprep.subr.bf16.mxu1 %v2295_v6  ;;  %v2300_v15 = vld [vmem:[#allocation7 + $0x140] ss:$8 sps:$4 sm:$0xff]   ;;  %v145_v6 = vsel %vm143_vm1, %v140_v61, %v142_v50  ;;  %v163_v50 = vrot.slane %v2630_v41, 1 }
  0x51   :  { %448 = vmatprep.subr.bf16.mxu0 %v2159_v17  ;;  %v2209_v17 = vld [vmem:[#allocation5 + $0x70] ss:$8 sps:$4 sm:$0xff]  }
  0x53   :  { %1274 = vmatpush1.bf16.msra.mxu1 %v2297_v10  ;;  %v2238_v10 = vld [vmem:[#allocation5 + $0x200] ss:$8 sps:$4 sm:$0xff]  }
  0x54   :  { %449 = vmatpush1.bf16.msra.mxu0 %v2161_v18  ;;  %v2214_v18 = vld [vmem:[#allocation5 + $0x84] ss:$8 sps:$4 sm:$0xff]   ;;  %1275 = vmatprep.subr.bf16.mxu1 %v2298_v12  ;;  %v139_v12 = vrot.slane %v2682_v2, 7 }
  0x55   :  { %450 = vmatprep.subr.bf16.mxu0 %v2162_v19  ;;  %v2303_v19 = vld [vmem:[#allocation7 + $0x150] ss:$8 sps:$4 sm:$0xff]  }
  0x57   :  { %1276 = vmatpush1.bf16.msra.mxu1 %v2300_v15  ;;  %v161_v15 = vrot.slane %v2627_v40, 1 }
  0x58   :  { %451 = vmatpush1.bf16.msra.mxu0 %v2164_v20  ;;  %v2304_v20 = vld [vmem:[#allocation7 + $0x164] ss:$8 sps:$4 sm:$0xff]   ;;  %1277 = vmatprep.subr.bf16.mxu1 %v2301_v16  ;;  %v2243_v16 = vld [vmem:[#allocation5 + $0x214] ss:$8 sps:$4 sm:$0xff]  }
  0x59   :  { %452 = vmatprep.subr.bf16.mxu0 %v2165_v21  ;;  %v2212_v21 = vld [vmem:[#allocation5 + $0x80] ss:$8 sps:$4 sm:$0xff]  }
  0x5b   :  { %1278 = vmatpush1.bf16.msra.mxu1 %v2303_v19  ;;  %v2241_v19 = vld [vmem:[#allocation5 + $0x210] ss:$8 sps:$4 sm:$0xff]  }
  0x5c   :  { %453 = vmatpush1.bf16.msra.mxu0 %v2167_v22  ;;  %v2217_v22 = vld [vmem:[#allocation5 + $0x94] ss:$8 sps:$4 sm:$0xff]   ;;  %1279 = vmatprep.subr.bf16.mxu1 %v2304_v20 }
  0x5d   :  { %454 = vmatprep.subr.bf16.mxu0 %v2168_v23  ;;  %v2306_v23 = vld [vmem:[#allocation7 + $0x160] ss:$8 sps:$4 sm:$0xff]  }
  0x5f   :  { %1280 = vmatpush1.bf16.msra.mxu1 %v2306_v23 }
  0x60   :  { %455 = vmatpush1.bf16.msra.mxu0 %v2170_v24  ;;  %v2307_v24 = vld [vmem:[#allocation7 + $0x174] ss:$8 sps:$4 sm:$0xff]  }
  0x61   :  { %456 = vmatprep.subr.bf16.mxu0 %v2171_v25  ;;  %v2215_v25 = vld [vmem:[#allocation5 + $0x90] ss:$8 sps:$4 sm:$0xff]   ;;  %1281 = vmatprep.subr.bf16.mxu1 %v2307_v24  ;;  %v174_v24 = vsel %vm168_vm6, %v161_v15, %v163_v50 }
  0x64   :  { %457 = vmatpush1.bf16.msra.mxu0 %v2173_v26  ;;  %v2220_v26 = vld [vmem:[#allocation5 + $0xa4] ss:$8 sps:$4 sm:$0xff]  }
  0x65   :  { %458 = vmatprep.subr.bf16.mxu0 %v2174_v27  ;;  %v2309_v27 = vld [vmem:[#allocation7 + $0x170] ss:$8 sps:$4 sm:$0xff]  }
  0x66   :  { %1282 = vmatpush1.bf16.msra.mxu1 %v2309_v27 }
  0x68   :  { %459 = vmatpush1.bf16.msra.mxu0 %v2176_v28  ;;  %v2310_v28 = vld [vmem:[#allocation7 + $0x184] ss:$8 sps:$4 sm:$0xff]  }
  0x69   :  { %460 = vmatprep.subr.bf16.mxu0 %v2177_v29  ;;  %v2218_v29 = vld [vmem:[#allocation5 + $0xa0] ss:$8 sps:$4 sm:$0xff]   ;;  %1283 = vmatprep.subr.bf16.mxu1 %v2310_v28  ;;  %v2249_v28 = vld [vmem:[#allocation5 + $0x234] ss:$8 sps:$4 sm:$0xff]  }
  0x6a   :  { %1284 = vmatpush1.bf16.msra.mxu1 %v2312_v31  ;;  %v2252_v31 = vld [vmem:[#allocation5 + $0x244] ss:$8 sps:$4 sm:$0xff]  }
  0x6c   :  { %461 = vmatpush1.bf16.msra.mxu0 %v2179_v30  ;;  %v2223_v30 = vld [vmem:[#allocation5 + $0xb4] ss:$8 sps:$4 sm:$0xff]  }
  0x6d   :  { %462 = vmatprep.subr.bf16.mxu0 %v2180_v32  ;;  %v2313_v32 = vld [vmem:[#allocation7 + $0x194] ss:$8 sps:$4 sm:$0xff]  }
  0x6e   :  { %1285 = vmatprep.subr.bf16.mxu1 %v2313_v32  ;;  %v2250_v32 = vld [vmem:[#allocation5 + $0x240] ss:$8 sps:$4 sm:$0xff]  }
  0x70   :  { %463 = vmatpush1.bf16.msra.mxu0 %v2182_v33  ;;  %v2221_v33 = vld [vmem:[#allocation5 + $0xb0] ss:$8 sps:$4 sm:$0xff]  }
  0x71   :  { %464 = vmatprep.subr.bf16.mxu0 %v2183_v35  ;;  %v2226_v35 = vld [vmem:[#allocation5 + $0xc4] ss:$8 sps:$4 sm:$0xff]  }
  0x74   :  { %465 = vmatpush1.bf16.msra.mxu0 %v2185_v36  ;;  %v2315_v36 = vld [vmem:[#allocation7 + $0x190] ss:$8 sps:$4 sm:$0xff]  }
  0x75   :  { %647 = vmatprep.subr.bf16.mxu0 %v2189_v37  ;;  %v2316_v37 = vld [vmem:[#allocation7 + $0x1a4] ss:$8 sps:$4 sm:$0xff]   ;;  %1286 = vmatpush1.bf16.msra.mxu1 %v2315_v36 }
  0x76   :  { %1287 = vmatprep.subr.bf16.mxu1 %v2316_v37  ;;  %v2258_v36 = vld [vmem:[#allocation5 + $0x264] ss:$8 sps:$4 sm:$0xff]   ;;  %v2256_v37 = vld [vmem:[#allocation5 + $0x260] ss:$8 sps:$4 sm:$0xff]  }
  0x77   :  { %467 = vmatmul.mubr.bf16.vlgmr.msra.gmra.mrb[0].mxu0 %v1853_v44  ;;  %v2229_v44 = vld [vmem:[#allocation5 + $0xd4] ss:$8 sps:$4 sm:$0xff]  }
  0x78   :  { %648 = vmatpush1.bf16.msra.mxu0 %v2187_v45  ;;  %476 = vmatprep.mubr.bf16.mxu0 %v1856_v46  ;;  %v2318_v45 = vld [vmem:[#allocation7 + $0x1a0] ss:$8 sps:$4 sm:$0xff]   ;;  %v2319_v46 = vld [vmem:[#allocation7 + $0x1b4] ss:$8 sps:$4 sm:$0xff]  }
  0x79   :  { %649 = vmatprep.subr.bf16.mxu0 %v2193_v49  ;;  %v2666_v49 = vunpack.c.l.bf16 %v2617_v14  ;;  %1288 = vmatpush1.bf16.msra.mxu1 %v2318_v45  ;;  %v2264_v45 = vld [vmem:[#allocation5 + $0x284] ss:$8 sps:$4 sm:$0xff]  }
  0x7a   :  { %1289 = vmatprep.subr.bf16.mxu1 %v2319_v46  ;;  %v2262_v46 = vld [vmem:[#allocation5 + $0x280] ss:$8 sps:$4 sm:$0xff]  }
  0x7b   :  { %v137_v14 = vrot.slane %v2666_v49, 7 }
  0x7c   :  { %650 = vmatpush1.bf16.msra.mxu0 %v2191_v51  ;;  %v2227_v51 = vld [vmem:[#allocation5 + $0xd0] ss:$8 sps:$4 sm:$0xff]  }
  0x7d   :  { %651 = vmatprep.subr.bf16.mxu0 %v2196_v52  ;;  %v2669_v52 = vunpack.c.l.bf16 %v2623_v38  ;;  %v2231_v38 = vld [vmem:[#allocation5 + $0xe0] ss:$8 sps:$4 sm:$0xff]  }
  0x7f   :  { %477 = vmatmul.mubr.bf16.gmra.mrb[4].mxu0 %v1855_v57  ;;  %v2321_v57 = vld [vmem:[#allocation7 + $0x1b0] ss:$8 sps:$4 sm:$0xff]  }
  0x80   :  { %652 = vmatpush1.bf16.msra.mxu0 %v2194_v56  ;;  %1923 = vmatprep.mubr.msk.bf16.mxu0 %vm2646_vm3, %v1922_v59  ;;  %v77_v56 = vadd.s32 16, %v2621_v34  ;;  %v141_v59 = vrot.slane %v2669_v52, 7 }
  0x81   :  { %653 = vmatprep.subr.bf16.mxu0 %v2199_v58  ;;  %v135_v58 = vrot.slane %v2663_v47, 7  ;;  %1290 = vmatpush1.bf16.msra.mxu1 %v2321_v57  ;;  %v2268_v57 = vld [vmem:[#allocation5 + $0x2a0] ss:$8 sps:$4 sm:$0xff]  }
  0x82   :  { %v97_v62 = vand.u32 15, %v77_v56  ;;  %1291 = vmatprep.subr.bf16.mxu1 %v2322_v13  ;;  %v144_v20 = vsel %vm143_vm1, %v139_v12, %v141_v59  ;;  %v2270_v56 = vld [vmem:[#allocation5 + $0x2a4] ss:$8 sps:$4 sm:$0xff]   ;;  %v2273_v13 = vld [vmem:[#allocation5 + $0x2b4] ss:$8 sps:$4 sm:$0xff]  }
  0x83   :  { %v148_v1 = vsel %vm143_vm1, %v135_v58, %v137_v14 }
  0x84   :  { %654 = vmatpush1.bf16.msra.mxu0 %v2197_v63  ;;  %v2324_v63 = vld [vmem:[#allocation7 + $0x1c0] ss:$8 sps:$4 sm:$0xff]   ;;  %vm129_vm4 = vcmp.ne.s32.totalorder %v97_v62, 0  ;;  %v78_v62 = vadd.s32 24, %v2621_v34 }
  0x85   :  { %655 = vmatprep.subr.bf16.mxu0 %v2202_v0  ;;  %v2325_v0 = vld [vmem:[#allocation7 + $0x1d4] ss:$8 sps:$4 sm:$0xff]   ;;  %1292 = vmatpush1.bf16.msra.mxu1 %v2324_v63  ;;  %vm2699_vm5 = vmpackc.low %vm2529_vm2, %vm129_vm4  ;;  %v160_v63 = vrot.slane %v2663_v47, 1 }
  0x86   :  { %1293 = vmatprep.subr.bf16.mxu1 %v2325_v0  ;;  %v162_v0 = vrot.slane %v2666_v49, 1 }
  0x88   :  { %656 = vmatpush1.bf16.msra.mxu0 %v2200_v3  ;;  %v2235_v3 = vld [vmem:[#allocation5 + $0xf0] ss:$8 sps:$4 sm:$0xff]  }
  0x89   :  { %657 = vmatprep.subr.bf16.mxu0 %v2205_v4  ;;  %v150_v4 = vsel %vm143_vm1, %v141_v59, %v135_v58  ;;  %v2271_v58 = vld [vmem:[#allocation5 + $0x2b0] ss:$8 sps:$4 sm:$0xff]   ;;  %v2274_v59 = vld [vmem:[#allocation5 + $0x2c0] ss:$8 sps:$4 sm:$0xff]  }
  0x8c   :  { %658 = vmatpush1.bf16.msra.mxu0 %v2203_v7  ;;  %v147_v7 = vsel %vm143_vm1, %v138_v48, %v140_v61  ;;  %v2282_v61 = vld [vmem:[#allocation5 + $0x2e4] ss:$8 sps:$4 sm:$0xff]   ;;  %v2400_v48 = vld [vmem:[#allocation7 + $0x260] ss:$8 sps:$4 sm:$0xff]  }
  0x8d   :  { %659 = vmatprep.subr.bf16.mxu0 %v2208_v8  ;;  %v2327_v8 = vld [vmem:[#allocation7 + $0x1d0] ss:$8 sps:$4 sm:$0xff]  }
  0x8e   :  { %1294 = vmatpush1.bf16.msra.mxu1 %v2327_v8 }
  0x90   :  { %660 = vmatpush1.bf16.msra.mxu0 %v2206_v9  ;;  %v1925_v9 = vpack.c.bf16 %v148_v1, %v150_v4  ;;  %v164_v1 = vrot.slane %v2682_v2, 1  ;;  %v2285_v4 = vld [vmem:[#allocation5 + $0x2f4] ss:$8 sps:$4 sm:$0xff]  }
  0x91   :  { %661 = vmatprep.subr.bf16.mxu0 %v2211_v11  ;;  %v1928_v11 = vpack.c.bf16 %v145_v6, %v147_v7  ;;  %v104_v6 = vand.u32 15, %v78_v62  ;;  %v173_v7 = vsel %vm168_vm6, %v160_v63, %v162_v0 }
  0x92   :  { %v171_v8 = vsel %vm168_vm6, %v162_v0, %v164_v1 }
  0x93   :  { %vm134_vm9 = vcmp.ne.s32.totalorder %v104_v6, 15 }
  0x94   :  { %662 = vmatpush1.bf16.msra.mxu0 %v2209_v17  ;;  %v165_v17 = vrot.slane %v2672_v54, 1  ;;  %vm2749_vm10 = vmpackc.low %vm134_vm9, %vm2529_vm2 }
  0x95   :  { %663 = vmatprep.subr.bf16.mxu0 %v2214_v18  ;;  %v90_v18 = vand.u32 15, %v76_v42  ;;  %v2283_v42 = vld [vmem:[#allocation5 + $0x2f0] ss:$8 sps:$4 sm:$0xff]  }
  0x96   :  { %v172_v23 = vsel %vm168_vm6, %v163_v50, %v165_v17  ;;  %v166_v50 = vrot.slane %v2669_v52, 1 }
  0x97   :  { %vm132_vm7 = vcmp.ne.s32.totalorder %v90_v18, 15  ;;  %v1966_v27 = vpack.c.bf16 %v172_v23, %v174_v24  ;;  %v2336_v23 = vld [vmem:[#allocation7 + $0x4] ss:$8 sps:$4 sm:$0xff]   ;;  %v962_v24 = vsub.s32 0, %v2621_v34 }
  0x98   :  { %664 = vmatpush1.bf16.msra.mxu0 %v2212_v21  ;;  %v146_v21 = vsel %vm143_vm1, %v137_v14, %v139_v12  ;;  %vm2722_vm8 = vmpackc.low %vm132_vm7, %vm2529_vm2  ;;  %v2276_v14 = vld [vmem:[#allocation5 + $0x2c4] ss:$8 sps:$4 sm:$0xff]  }
  0x99   :  { %665 = vmatprep.subr.bf16.mxu0 %v2217_v22  ;;  %v2246_v22 = vld [vmem:[#allocation5 + $0x224] ss:$8 sps:$4 sm:$0xff]  }
  0x9c   :  { %666 = vmatpush1.bf16.msra.mxu0 %v2215_v25  ;;  %v1931_v25 = vpack.c.bf16 %v144_v20, %v146_v21  ;;  %v2330_v20 = vld [vmem:[#allocation7 + $0x1e0] ss:$8 sps:$4 sm:$0xff]   ;;  %v2331_v21 = vld [vmem:[#allocation7 + $0x1f4] ss:$8 sps:$4 sm:$0xff]  }
  0x9d   :  { %667 = vmatprep.subr.bf16.mxu0 %v2220_v26  ;;  %v2244_v26 = vld [vmem:[#allocation5 + $0x220] ss:$8 sps:$4 sm:$0xff]  }
  0xa0   :  { %668 = vmatpush1.bf16.msra.mxu0 %v2218_v29 }
  0xa1   :  { %669 = vmatprep.subr.bf16.mxu0 %v2223_v30  ;;  %v2247_v30 = vld [vmem:[#allocation5 + $0x230] ss:$8 sps:$4 sm:$0xff]  }
  0xa4   :  { %670 = vmatpush1.bf16.msra.mxu0 %v2221_v33  ;;  %v2255_v33 = vld [vmem:[#allocation5 + $0x254] ss:$8 sps:$4 sm:$0xff]  }
  0xa5   :  { %671 = vmatprep.subr.bf16.mxu0 %v2226_v35  ;;  %v2253_v35 = vld [vmem:[#allocation5 + $0x250] ss:$8 sps:$4 sm:$0xff]  }
  0xa8   :  { %672 = vmatpush1.bf16.msra.mxu0 %v2224_v39  ;;  %v2261_v39 = vld [vmem:[#allocation5 + $0x274] ss:$8 sps:$4 sm:$0xff]  }
  0xa9   :  { %673 = vmatprep.subr.bf16.mxu0 %v2229_v44  ;;  %v2259_v44 = vld [vmem:[#allocation5 + $0x270] ss:$8 sps:$4 sm:$0xff]  }
  0xac   :  { %674 = vmatpush1.bf16.msra.mxu0 %v2227_v51  ;;  %v2267_v51 = vld [vmem:[#allocation5 + $0x294] ss:$8 sps:$4 sm:$0xff]  }
  0xad   :  { %675 = vmatprep.subr.bf16.mxu0 %v2233_v55  ;;  %v2265_v55 = vld [vmem:[#allocation5 + $0x290] ss:$8 sps:$4 sm:$0xff]  }
  0xb0   :  { %676 = vmatpush1.bf16.msra.mxu0 %v2231_v38  ;;  %v2279_v38 = vld [vmem:[#allocation5 + $0x2d4] ss:$8 sps:$4 sm:$0xff]  }
  0xb1   :  { %677 = vmatprep.subr.bf16.mxu0 %v2237_v60  ;;  %v2277_v60 = vld [vmem:[#allocation5 + $0x2d0] ss:$8 sps:$4 sm:$0xff]  }
  0xb4   :  { %678 = vmatpush1.bf16.msra.mxu0 %v2235_v3  ;;  %v2280_v3 = vld [vmem:[#allocation5 + $0x2e0] ss:$8 sps:$4 sm:$0xff]  }
  0xb5   :  { %897 = vmatprep.subr.bf16.mxu0 %v2240_v5  ;;  %v167_v5 = vrot.slane %v2635_v43, 1 }
  0xb7   :  { %1926 = vmatmul.mubr.msk.bf16.vlgmr.msra.gmra.mrb[0].mxu0 %vm2646_vm3, %v1925_v9  ;;  %v170_v9 = vsel %vm168_vm6, %v165_v17, %v167_v5  ;;  %v175_v17 = vsel %vm168_vm6, %v166_v50, %v160_v63  ;;  %v2334_v63 = vld [vmem:[#allocation7] ss:$8 sps:$4 sm:$0xff]  }
  0xb8   :  { %898 = vmatpush1.bf16.msra.mxu0 %v2238_v10  ;;  %1929 = vmatprep.mubr.msk.bf16.mxu0 %vm2699_vm5, %v1928_v11  ;;  %v176_v10 = vsel %vm168_vm6, %v167_v5, %v161_v15  ;;  %v1969_v11 = vpack.c.bf16 %v171_v8, %v173_v7  ;;  %v169_v15 = vsel %vm168_vm6, %v164_v1, %v166_v50  ;;  %v2339_v5 = vld [vmem:[#allocation7 + $0x14] ss:$8 sps:$4 sm:$0xff]  }
  0xb9   :  { %899 = vmatprep.subr.bf16.mxu0 %v2243_v16  ;;  %v1972_v12 = vpack.c.bf16 %v176_v10, %v170_v9  ;;  %v1975_v18 = vpack.c.bf16 %v175_v17, %v169_v15  ;;  %v2337_v15 = vld [vmem:[#allocation7 + $0x10] ss:$8 sps:$4 sm:$0xff]  }
  0xbc   :  { %900 = vmatpush1.bf16.msra.mxu0 %v2241_v19  ;;  %v2328_v19 = vld [vmem:[#allocation7 + $0x1e4] ss:$8 sps:$4 sm:$0xff]  }
  0xbd   :  { %901 = vmatprep.subr.bf16.mxu0 %v2246_v22  ;;  %1295 = vmatprep.subr.bf16.mxu1 %v2328_v19  ;;  %v2333_v22 = vld [vmem:[#allocation7 + $0x1f0] ss:$8 sps:$4 sm:$0xff]  }
  0xbe   :  { %1296 = vmatpush1.bf16.msra.mxu1 %v2330_v20  ;;  %v2342_v20 = vld [vmem:[#allocation7 + $0x24] ss:$8 sps:$4 sm:$0xff]  }
  0xbf   :  { %1932 = vmatmul.mubr.msk.bf16.gmra.mrb[4].mxu0 %vm2699_vm5, %v1931_v25  ;;  %1297 = vmatprep.subr.bf16.mxu1 %v2331_v21  ;;  %v958_v25 = vld [vmem:[%s2931_s2] sm:$0x3] }
  0xc0   :  { %902 = vmatpush1.bf16.msra.mxu0 %v2244_v26  ;;  %1967 = vmatprep.mubr.msk.bf16.mxu0 %vm2722_vm8, %v1966_v27  ;;  %v966_v26 = vsub.s32 1, %v2621_v34  ;;  %v963_v27 = vrot.slane %v958_v25, %v962_v24 }
  0xc1   :  { %903 = vmatprep.subr.bf16.mxu0 %v2249_v28 }
  0xc2   :  { %1298 = vmatpush1.bf16.msra.mxu1 %v2333_v22  ;;  %v967_v28 = vrot.slane %v958_v25, %v966_v26 }
  0xc3   :  { %1480 = vmatprep.subr.bf16.mxu1 %v2336_v23 }
  0xc4   :  { %904 = vmatpush1.bf16.msra.mxu0 %v2247_v30 }
  0xc5   :  { %905 = vmatprep.subr.bf16.mxu0 %v2252_v31 }
  0xc8   :  { %906 = vmatpush1.bf16.msra.mxu0 %v2250_v32 }
  0xc9   :  { %907 = vmatprep.subr.bf16.mxu0 %v2255_v33 }
  0xcc   :  { %908 = vmatpush1.bf16.msra.mxu0 %v2253_v35 }
  0xcd   :  { %909 = vmatprep.subr.bf16.mxu0 %v2258_v36 }
  0xd0   :  { %910 = vmatpush1.bf16.msra.mxu0 %v2256_v37 }
  0xd1   :  { %911 = vmatprep.subr.bf16.mxu0 %v2261_v39 }
  0xd4   :  { %912 = vmatpush1.bf16.msra.mxu0 %v2259_v44 }
  0xd5   :  { %913 = vmatprep.subr.bf16.mxu0 %v2264_v45 }
  0xd8   :  { %914 = vmatpush1.bf16.msra.mxu0 %v2262_v46 }
  0xd9   :  { %915 = vmatprep.subr.bf16.mxu0 %v2267_v51 }
  0xdc   :  { %916 = vmatpush1.bf16.msra.mxu0 %v2265_v55 }
  0xdd   :  { %917 = vmatprep.subr.bf16.mxu0 %v2270_v56 }
  0xe0   :  { %918 = vmatpush1.bf16.msra.mxu0 %v2268_v57 }
  0xe1   :  { %919 = vmatprep.subr.bf16.mxu0 %v2273_v13 }
  0xe4   :  { %920 = vmatpush1.bf16.msra.mxu0 %v2271_v58 }
  0xe5   :  { %921 = vmatprep.subr.bf16.mxu0 %v2276_v14 }
  0xe8   :  { %922 = vmatpush1.bf16.msra.mxu0 %v2274_v59 }
  0xe9   :  { %923 = vmatprep.subr.bf16.mxu0 %v2279_v38 }
  0xec   :  { %924 = vmatpush1.bf16.msra.mxu0 %v2277_v60 }
  0xed   :  { %925 = vmatprep.subr.bf16.mxu0 %v2282_v61 }
  0xf0   :  { %926 = vmatpush1.bf16.msra.mxu0 %v2280_v3 }
  0xf1   :  { %927 = vmatprep.subr.bf16.mxu0 %v2285_v4 }
  0xf4   :  { %928 = vmatpush1.bf16.msra.mxu0 %v2283_v42 }
  0xf7   :  { %1970 = vmatmul.mubr.msk.bf16.vlgmr.msra.gmra.mrb[0].mxu0 %vm2722_vm8, %v1969_v11 }
  0xf8   :  { %1973 = vmatprep.mubr.msk.bf16.mxu0 %vm2749_vm10, %v1972_v12 }
  0xff   :  { %1976 = vmatmul.mubr.msk.bf16.gmra.mrb[4].mxu0 %vm2749_vm10, %v1975_v18 }
 0x1ca   :  { %v931_v30 = vpop.f32.mrb[0].mxu0 }
 0x1cb   :  { %v970_v31 = vadd.f32 %v963_v27, %v931_v30  ;;  %v933_v32 = vpop.f32.mrb[1].mxu0 }
 0x1cc   :  { %v971_v33 = vadd.f32 %v967_v28, %v933_v32  ;;  %v935_v35 = vpop.f32.mrb[2].mxu0 }
 0x1cd   :  { %v2772_v36 = vmax.f32 %v970_v31, 0.0  ;;  %v972_v37 = vadd.f32 %v963_v27, %v935_v35  ;;  %v937_v39 = vpop.f32.mrb[3].mxu0 }
 0x1ce   :  { %v2774_v44 = vmax.f32 %v971_v33, 0.0  ;;  %v973_v45 = vadd.f32 %v967_v28, %v937_v39 }
 0x1cf   :  { %v980_v46 = vmax.f32 %v972_v37, 0.0  ;;  %v986_v51 = vrot.slane %v2772_v36, 7  ;;  %v1010_v55 = vrot.slane %v2772_v36, 1  ;;  %v2340_v37 = vld [vmem:[#allocation7 + $0x20] ss:$8 sps:$4 sm:$0xff]  }
 0x1d0   :  { %v2778_v56 = vmax.f32 %v973_v45, 0.0  ;;  %v987_v57 = vrot.slane %v2774_v44, 7  ;;  %v1011_v59 = vrot.slane %v2774_v44, 1 }
 0x1d1   :  { %v988_v13 = vrot.slane %v980_v46, 7  ;;  %v1012_v58 = vrot.slane %v980_v46, 1  ;;  %v1070_v14 = vpack.c.bf16 %v980_v46, %v2772_v36  ;;  %v2349_v36 = vld [vmem:[#allocation7 + $0x50] ss:$8 sps:$4 sm:$0xff]  }
 0x1d2   :  { %v989_v38 = vrot.slane %v2778_v56, 7  ;;  %v1013_v60 = vrot.slane %v2778_v56, 1  ;;  %v941_v61 = vpop.f32.mrb[4].mxu0  ;;  %v1071_v62 = vpack.c.bf16 %v2778_v56, %v2774_v44  ;;  %v2345_v44 = vld [vmem:[#allocation7 + $0x34] ss:$8 sps:$4 sm:$0xff]  }
 0x1d3   :  { %v2789_v0 = vsel %vm143_vm1, %v986_v51, %v988_v13  ;;  %v2795_v1 = vsel %vm168_vm6, %v1010_v55, %v1012_v58  ;;  %v974_v3 = vadd.f32 %v963_v27, %v941_v61  ;;  %v943_v4 = vpop.f32.mrb[5].mxu0 }
 0x1d4   :  { %v975_v6 = vadd.f32 %v967_v28, %v943_v4  ;;  %v945_v7 = vpop.f32.mrb[6].mxu0  ;;  %1299 = vmatprep.mubr.bf16.mxu1 %v1071_v62  ;;  %v999_v42 = vsel %vm143_vm1, %v987_v57, %v989_v38  ;;  %v2801_v8 = vsel %vm168_vm6, %v1011_v59, %v1013_v60 }
 0x1d5   :  { %v982_v9 = vmax.f32 %v974_v3, 0.0  ;;  %v976_v10 = vadd.f32 %v963_v27, %v945_v7  ;;  %v947_v11 = vpop.f32.mrb[7].mxu0  ;;  %1300 = vmatmul.mubr.bf16.vlgmr.msra.gmra.mrb[0].mxu1 %v1070_v14 }
 0x1d6   :  { %v983_v12 = vmax.f32 %v975_v6, 0.0  ;;  %v977_v50 = vadd.f32 %v967_v28, %v947_v11  ;;  %1481 = vmatpush1.bf16.msra.mxu1 %v2334_v63  ;;  %v2348_v6 = vld [vmem:[#allocation7 + $0x44] ss:$8 sps:$4 sm:$0xff]   ;;  %v2357_v11 = vld [vmem:[#allocation7 + $0x74] ss:$8 sps:$4 sm:$0xff]  }
 0x1d7   :  { %v990_v17 = vrot.slane %v982_v9, 7  ;;  %v1014_v18 = vrot.slane %v982_v9, 1  ;;  %v984_v19 = vmax.f32 %v976_v10, 0.0  ;;  %1482 = vmatprep.subr.bf16.mxu1 %v2339_v5  ;;  %v2352_v10 = vld [vmem:[#allocation7 + $0x60] ss:$8 sps:$4 sm:$0xff]  }
 0x1d8   :  { %v991_v21 = vrot.slane %v983_v12, 7  ;;  %v1015_v22 = vrot.slane %v983_v12, 1  ;;  %v985_v23 = vmax.f32 %v977_v50, 0.0  ;;  %v2360_v50 = vld [vmem:[#allocation7 + $0x84] ss:$8 sps:$4 sm:$0xff]  }
 0x1d9   :  { %v2805_v25 = vsel %vm168_vm6, %v1012_v58, %v1014_v18  ;;  %v992_v30 = vrot.slane %v984_v19, 7  ;;  %v1016_v27 = vrot.slane %v984_v19, 1  ;;  %v1072_v31 = vpack.c.bf16 %v984_v19, %v982_v9  ;;  %v2351_v9 = vld [vmem:[#allocation7 + $0x54] ss:$8 sps:$4 sm:$0xff]   ;;  %v2366_v19 = vld [vmem:[#allocation7 + $0xa4] ss:$8 sps:$4 sm:$0xff]  }
 0x1da   :  { %v2089_v28 = vpack.c.bf16 %v2805_v25, %v2795_v1  ;;  %v993_v32 = vrot.slane %v985_v23, 7  ;;  %v1017_v33 = vrot.slane %v985_v23, 1  ;;  %1483 = vmatpush1.bf16.msra.mxu1 %v2337_v15  ;;  %v1073_v35 = vpack.c.bf16 %v985_v23, %v983_v12  ;;  %v2355_v12 = vld [vmem:[#allocation7 + $0x70] ss:$8 sps:$4 sm:$0xff]   ;;  %v2358_v15 = vld [vmem:[#allocation7 + $0x80] ss:$8 sps:$4 sm:$0xff]  }
 0x1db   :  { %v2811_v39 = vsel %vm143_vm1, %v992_v30, %v986_v51  ;;  %1484 = vmatprep.subr.bf16.mxu1 %v2342_v20  ;;  %v2815_v45 = vsel %vm143_vm1, %v989_v38, %v991_v21  ;;  %v2819_v46 = vsel %vm143_vm1, %v990_v17, %v992_v30  ;;  %v2823_v56 = vsel %vm143_vm1, %v988_v13, %v990_v17  ;;  %v2363_v17 = vld [vmem:[#allocation7 + $0x94] ss:$8 sps:$4 sm:$0xff]   ;;  %v2364_v20 = vld [vmem:[#allocation7 + $0xa0] ss:$8 sps:$4 sm:$0xff]   ;;  %v2372_v23 = vld [vmem:[#allocation7 + $0xc4] ss:$8 sps:$4 sm:$0xff]  }
 0x1dc   :  { %v2045_v58 = vpack.c.bf16 %v2789_v0, %v2811_v39  ;;  %1309 = vmatprep.mubr.bf16.mxu1 %v1073_v35  ;;  %v1001_v51 = vsel %vm143_vm1, %v993_v32, %v987_v57  ;;  %v2831_v14 = vsel %vm143_vm1, %v991_v21, %v993_v32  ;;  %v2051_v38 = vpack.c.bf16 %v2819_v46, %v2823_v56  ;;  %v2343_v57 = vld [vmem:[#allocation7 + $0x30] ss:$8 sps:$4 sm:$0xff]   ;;  %v2369_v21 = vld [vmem:[#allocation7 + $0xb4] ss:$8 sps:$4 sm:$0xff]   ;;  %v2370_v30 = vld [vmem:[#allocation7 + $0xc0] ss:$8 sps:$4 sm:$0xff]  }
 0x1dd   :  { %1310 = vmatmul.mubr.bf16.gmra.mrb[4].mxu1 %v1072_v31  ;;  %v2042_v61 = vpack.c.bf16 %v999_v42, %v1001_v51  ;;  %v2048_v13 = vpack.c.bf16 %v2831_v14, %v2815_v45  ;;  %v2839_v62 = vsel %vm168_vm6, %v1013_v60, %v1015_v22  ;;  %v2843_v63 = vsel %vm168_vm6, %v1015_v22, %v1017_v33  ;;  %v2346_v42 = vld [vmem:[#allocation7 + $0x40] ss:$8 sps:$4 sm:$0xff]   ;;  %v2367_v22 = vld [vmem:[#allocation7 + $0xb0] ss:$8 sps:$4 sm:$0xff]   ;;  %v2378_v32 = vld [vmem:[#allocation7 + $0xe4] ss:$8 sps:$4 sm:$0xff]  }
 0x1de   :  { %1485 = vmatpush1.bf16.msra.mxu1 %v2340_v37  ;;  %v2086_v3 = vpack.c.bf16 %v2839_v62, %v2801_v8  ;;  %v2849_v4 = vsel %vm168_vm6, %v1017_v33, %v1011_v59  ;;  %v2853_v5 = vsel %vm168_vm6, %v1014_v18, %v1016_v27  ;;  %v2859_v60 = vsel %vm168_vm6, %v1016_v27, %v1010_v55  ;;  %v2354_v55 = vld [vmem:[#allocation7 + $0x64] ss:$8 sps:$4 sm:$0xff]   ;;  %v2361_v18 = vld [vmem:[#allocation7 + $0x90] ss:$8 sps:$4 sm:$0xff]   ;;  %v2375_v27 = vld [vmem:[#allocation7 + $0xd4] ss:$8 sps:$4 sm:$0xff]  }
 0x1df   :  { %2043 = vmatprep.mubr.msk.bf16.mxu1 %vm2646_vm3, %v2042_v61  ;;  %1486 = vmatprep.subr.bf16.mxu1 %v2345_v44  ;;  %v2092_v7 = vpack.c.bf16 %v2849_v4, %v2843_v63  ;;  %v2095_v59 = vpack.c.bf16 %v2859_v60, %v2853_v5  ;;  %v2373_v31 = vld [vmem:[#allocation7 + $0xd0] ss:$8 sps:$4 sm:$0xff]   ;;  %v2376_v33 = vld [vmem:[#allocation7 + $0xe0] ss:$8 sps:$4 sm:$0xff]   ;;  %v2381_v35 = vld [vmem:[#allocation7 + $0xf4] ss:$8 sps:$4 sm:$0xff]  }
 0x1e0   :  { %v2379_v37 = vld [vmem:[#allocation7 + $0xf0] ss:$8 sps:$4 sm:$0xff]   ;;  %v2384_v44 = vld [vmem:[#allocation7 + $0x204] ss:$8 sps:$4 sm:$0xff]   ;;  %v2382_v51 = vld [vmem:[#allocation7 + $0x200] ss:$8 sps:$4 sm:$0xff]  }
 0x1e1   :  { %v2387_v61 = vld [vmem:[#allocation7 + $0x214] ss:$8 sps:$4 sm:$0xff]   ;;  %v2396_v0 = vld [vmem:[#allocation7 + $0x244] ss:$8 sps:$4 sm:$0xff]   ;;  %v2394_v39 = vld [vmem:[#allocation7 + $0x240] ss:$8 sps:$4 sm:$0xff]  }
 0x1e2   :  { %1487 = vmatpush1.bf16.msra.mxu1 %v2343_v57  ;;  %v2385_v57 = vld [vmem:[#allocation7 + $0x210] ss:$8 sps:$4 sm:$0xff]   ;;  %v2399_v45 = vld [vmem:[#allocation7 + $0x254] ss:$8 sps:$4 sm:$0xff]   ;;  %v2402_v46 = vld [vmem:[#allocation7 + $0x264] ss:$8 sps:$4 sm:$0xff]  }
 0x1e3   :  { %1488 = vmatprep.subr.bf16.mxu1 %v2348_v6  ;;  %v2390_v6 = vld [vmem:[#allocation7 + $0x224] ss:$8 sps:$4 sm:$0xff]   ;;  %v2405_v56 = vld [vmem:[#allocation7 + $0x274] ss:$8 sps:$4 sm:$0xff]   ;;  %v2403_v8 = vld [vmem:[#allocation7 + $0x270] ss:$8 sps:$4 sm:$0xff]  }
 0x1e4   :  { %v2408_v14 = vld [vmem:[#allocation7 + $0x284] ss:$8 sps:$4 sm:$0xff]   ;;  %v2409_v62 = vld [vmem:[#allocation7 + $0x290] ss:$8 sps:$4 sm:$0xff]  }
 0x1e6   :  { %1489 = vmatpush1.bf16.msra.mxu1 %v2346_v42  ;;  %v2388_v42 = vld [vmem:[#allocation7 + $0x220] ss:$8 sps:$4 sm:$0xff]  }
 0x1e7   :  { %1490 = vmatprep.subr.bf16.mxu1 %v2351_v9  ;;  %v2393_v9 = vld [vmem:[#allocation7 + $0x234] ss:$8 sps:$4 sm:$0xff]  }
 0x1ea   :  { %1491 = vmatpush1.bf16.msra.mxu1 %v2349_v36  ;;  %v2412_v36 = vld [vmem:[#allocation7 + $0x2a0] ss:$8 sps:$4 sm:$0xff]  }
 0x1eb   :  { %1492 = vmatprep.subr.bf16.mxu1 %v2354_v55  ;;  %v2417_v55 = vld [vmem:[#allocation7 + $0x2b4] ss:$8 sps:$4 sm:$0xff]  }
 0x1ee   :  { %1493 = vmatpush1.bf16.msra.mxu1 %v2352_v10  ;;  %v2415_v10 = vld [vmem:[#allocation7 + $0x2b0] ss:$8 sps:$4 sm:$0xff]  }
 0x1ef   :  { %1494 = vmatprep.subr.bf16.mxu1 %v2357_v11  ;;  %v2420_v11 = vld [vmem:[#allocation7 + $0x2c4] ss:$8 sps:$4 sm:$0xff]  }
 0x1f2   :  { %1495 = vmatpush1.bf16.msra.mxu1 %v2355_v12  ;;  %v2418_v12 = vld [vmem:[#allocation7 + $0x2c0] ss:$8 sps:$4 sm:$0xff]  }
 0x1f3   :  { %1496 = vmatprep.subr.bf16.mxu1 %v2360_v50  ;;  %v2423_v50 = vld [vmem:[#allocation7 + $0x2d4] ss:$8 sps:$4 sm:$0xff]  }
 0x1f6   :  { %1497 = vmatpush1.bf16.msra.mxu1 %v2358_v15  ;;  %v2421_v15 = vld [vmem:[#allocation7 + $0x2d0] ss:$8 sps:$4 sm:$0xff]  }
 0x1f7   :  { %1498 = vmatprep.subr.bf16.mxu1 %v2363_v17  ;;  %v2426_v17 = vld [vmem:[#allocation7 + $0x2e4] ss:$8 sps:$4 sm:$0xff]  }
 0x1fa   :  { %1499 = vmatpush1.bf16.msra.mxu1 %v2361_v18  ;;  %v2424_v18 = vld [vmem:[#allocation7 + $0x2e0] ss:$8 sps:$4 sm:$0xff]  }
 0x1fb   :  { %1500 = vmatprep.subr.bf16.mxu1 %v2366_v19  ;;  %v2429_v19 = vld [vmem:[#allocation7 + $0x2f4] ss:$8 sps:$4 sm:$0xff]  }
 0x1fe   :  { %1501 = vmatpush1.bf16.msra.mxu1 %v2364_v20  ;;  %v2427_v20 = vld [vmem:[#allocation7 + $0x2f0] ss:$8 sps:$4 sm:$0xff]  }
 0x1ff   :  { %1502 = vmatprep.subr.bf16.mxu1 %v2369_v21  ;;  %v1791_v21 = vld [vmem:[%s2933_s4] sm:$0x3]  ;;  %s2530_s4 = smov [#allocation8]  }
 0x200   :  { %v1796_v29 = vrot.slane %v1791_v21, %v962_v24  ;;  %v1800_v1 = vrot.slane %v1791_v21, %v966_v26  ;;  %s1840_s6 = sshll.u32 %s2530_s4, 4  ;;  %s1841_s6 = int_to_ptr.vmem [resolvable:$true] %s1840_s6 }
 0x201   :  { %s2496_s7 = scalar_lea.vmem %s1841_s6, 1024  ;;  %p2501_p11 = scmp.lt.s32.totalorder %s1841_s6, %s1841_s6 }
 0x202   :  { %1503 = vmatpush1.bf16.msra.mxu1 %v2367_v22  ;;  %p2497_p10 = scmp.ne.s32.totalorder %s1841_s6, %s2496_s7  ;;  %p2502_p12 = scmp.lt.s32.totalorder %s2496_s7, %s2496_s7 }
 0x203   :  { %1504 = vmatprep.subr.bf16.mxu1 %v2372_v23 }
 0x204   :  { %p2503_p13 = por %p2502_p12, %p2501_p11 }
 0x206   :  { %1505 = vmatpush1.bf16.msra.mxu1 %v2370_v30  ;;  %p2504_p0 = pnand %p2503_p13, %p2497_p10 }
 0x207   :  { %1506 = vmatprep.subr.bf16.mxu1 %v2375_v27 }
 0x20a   :  { %1507 = vmatpush1.bf16.msra.mxu1 %v2373_v31 }
 0x20b   :  { %1508 = vmatprep.subr.bf16.mxu1 %v2378_v32 }
 0x20e   :  { %1509 = vmatpush1.bf16.msra.mxu1 %v2376_v33 }
 0x20f   :  { %1510 = vmatprep.subr.bf16.mxu1 %v2381_v35 }
 0x212   :  { %1511 = vmatpush1.bf16.msra.mxu1 %v2379_v37 }
 0x213   :  { %1730 = vmatprep.subr.bf16.mxu1 %v2384_v44 }
 0x215   :  { %2046 = vmatmul.mubr.msk.bf16.vlgmr.msra.gmra.mrb[0].mxu1 %vm2646_vm3, %v2045_v58  ;;  %v2397_v58 = vld [vmem:[#allocation7 + $0x250] ss:$8 sps:$4 sm:$0xff]  }
 0x216   :  { %2049 = vmatprep.mubr.msk.bf16.mxu1 %vm2699_vm5, %v2048_v13  ;;  %1731 = vmatpush1.bf16.msra.mxu1 %v2382_v51  ;;  %v2411_v13 = vld [vmem:[#allocation7 + $0x294] ss:$8 sps:$4 sm:$0xff]  }
 0x217   :  { %1732 = vmatprep.subr.bf16.mxu1 %v2387_v61 }
 0x21a   :  { %1733 = vmatpush1.bf16.msra.mxu1 %v2385_v57 }
 0x21b   :  { %1734 = vmatprep.subr.bf16.mxu1 %v2390_v6 }
 0x21d   :  { %2052 = vmatmul.mubr.msk.bf16.gmra.mrb[4].mxu1 %vm2699_vm5, %v2051_v38  ;;  %v2406_v38 = vld [vmem:[#allocation7 + $0x280] ss:$8 sps:$4 sm:$0xff]  }
 0x21e   :  { %1735 = vmatpush1.bf16.msra.mxu1 %v2388_v42  ;;  %2087 = vmatprep.mubr.msk.bf16.mxu1 %vm2722_vm8, %v2086_v3  ;;  %v2414_v3 = vld [vmem:[#allocation7 + $0x2a4] ss:$8 sps:$4 sm:$0xff]  }
 0x21f   :  { %1736 = vmatprep.subr.bf16.mxu1 %v2393_v9 }
 0x222   :  { %1737 = vmatpush1.bf16.msra.mxu1 %v2391_v53 }
 0x223   :  { %1738 = vmatprep.subr.bf16.mxu1 %v2396_v0 }
 0x226   :  { %1739 = vmatpush1.bf16.msra.mxu1 %v2394_v39 }
 0x227   :  { %1740 = vmatprep.subr.bf16.mxu1 %v2399_v45 }
 0x22a   :  { %1741 = vmatpush1.bf16.msra.mxu1 %v2397_v58 }
 0x22b   :  { %1742 = vmatprep.subr.bf16.mxu1 %v2402_v46 }
 0x22e   :  { %1743 = vmatpush1.bf16.msra.mxu1 %v2400_v48 }
 0x22f   :  { %1744 = vmatprep.subr.bf16.mxu1 %v2405_v56 }
 0x232   :  { %1745 = vmatpush1.bf16.msra.mxu1 %v2403_v8 }
 0x233   :  { %1746 = vmatprep.subr.bf16.mxu1 %v2408_v14 }
 0x236   :  { %1747 = vmatpush1.bf16.msra.mxu1 %v2406_v38 }
 0x237   :  { %1748 = vmatprep.subr.bf16.mxu1 %v2411_v13 }
 0x23a   :  { %1749 = vmatpush1.bf16.msra.mxu1 %v2409_v62 }
 0x23b   :  { %1750 = vmatprep.subr.bf16.mxu1 %v2414_v3 }
 0x23e   :  { %1751 = vmatpush1.bf16.msra.mxu1 %v2412_v36 }
 0x23f   :  { %1752 = vmatprep.subr.bf16.mxu1 %v2417_v55 }
 0x242   :  { %1753 = vmatpush1.bf16.msra.mxu1 %v2415_v10 }
 0x243   :  { %1754 = vmatprep.subr.bf16.mxu1 %v2420_v11 }
 0x246   :  { %1755 = vmatpush1.bf16.msra.mxu1 %v2418_v12 }
 0x247   :  { %1756 = vmatprep.subr.bf16.mxu1 %v2423_v50 }
 0x24a   :  { %1757 = vmatpush1.bf16.msra.mxu1 %v2421_v15 }
 0x24b   :  { %1758 = vmatprep.subr.bf16.mxu1 %v2426_v17 }
 0x24e   :  { %1759 = vmatpush1.bf16.msra.mxu1 %v2424_v18 }
 0x24f   :  { %1760 = vmatprep.subr.bf16.mxu1 %v2429_v19 }
 0x252   :  { %1761 = vmatpush1.bf16.msra.mxu1 %v2427_v20 }
 0x255   :  { %2090 = vmatmul.mubr.msk.bf16.vlgmr.msra.gmra.mrb[0].mxu1 %vm2722_vm8, %v2089_v28 }
 0x256   :  { %2093 = vmatprep.mubr.msk.bf16.mxu1 %vm2749_vm10, %v2092_v7 }
 0x25d   :  { %2096 = vmatmul.mubr.msk.bf16.gmra.mrb[4].mxu1 %vm2749_vm10, %v2095_v59 }
 0x328   :  { %v1764_v25 = vpop.f32.mrb[0].mxu1 }
 0x329   :  { %v1803_v28 = vadd.f32 %v1796_v29, %v1764_v25  ;;  %v1766_v63 = vpop.f32.mrb[1].mxu1 }
 0x32a   :  { %v1804_v4 = vadd.f32 %v1800_v1, %v1766_v63  ;;  %v1768_v7 = vpop.f32.mrb[2].mxu1 }
 0x32b   :  { %v1811_v5 = vadd.f32 %v1803_v28, %v2663_v47  ;;  %v1805_v60 = vadd.f32 %v1796_v29, %v1768_v7  ;;  %v1770_v16 = vpop.f32.mrb[3].mxu1 }
 0x32c   :  { %v1812_v59 = vadd.f32 %v1804_v4, %v2627_v40  ;;  %v1806_v22 = vadd.f32 %v1800_v1, %v1770_v16 }
 0x32d   :  { %v1819_v23 = vmax.f32 %v1811_v5, 0.0  ;;  %v1813_v30 = vadd.f32 %v1805_v60, %v2666_v49 }
 0x32e   :  { %v1820_v27 = vmax.f32 %v1812_v59, 0.0  ;;  %v1814_v24 = vadd.f32 %v1806_v22, %v2630_v41 }
 0x32f   :  { %1827 = vst [vmem:[#allocation8] sm:$0xff] %v1819_v23  ;;  %v1821_v34 = vmax.f32 %v1813_v30, 0.0 }
 0x330   :  { %1828 = vst [vmem:[#allocation8 + $0x8] sm:$0xff] %v1820_v27  ;;  %v1822_v26 = vmax.f32 %v1814_v24, 0.0  ;;  %v1774_v31 = vpop.f32.mrb[4].mxu1 }
 0x331   :  { %1829 = vst [vmem:[#allocation8 + $0x10] sm:$0xff] %v1821_v34  ;;  %v1807_v32 = vadd.f32 %v1796_v29, %v1774_v31  ;;  %v1776_v33 = vpop.f32.mrb[5].mxu1 }
 0x332   :  { %1830 = vst [vmem:[#allocation8 + $0x18] sm:$0xff] %v1822_v26  ;;  %v1808_v47 = vadd.f32 %v1800_v1, %v1776_v33  ;;  %v1778_v35 = vpop.f32.mrb[6].mxu1 }
 0x333   :  { %v1815_v40 = vadd.f32 %v1807_v32, %v2682_v2  ;;  %v1809_v37 = vadd.f32 %v1796_v29, %v1778_v35  ;;  %v1780_v44 = vpop.f32.mrb[7].mxu1 }
 0x334   :  { %v1816_v49 = vadd.f32 %v1808_v47, %v2672_v54  ;;  %v1810_v51 = vadd.f32 %v1800_v1, %v1780_v44 }
 0x335   :  { %v1823_v61 = vmax.f32 %v1815_v40, 0.0  ;;  %v1817_v41 = vadd.f32 %v1809_v37, %v2669_v52 }
 0x336   :  { %v1824_v57 = vmax.f32 %v1816_v49, 0.0  ;;  %v1818_v6 = vadd.f32 %v1810_v51, %v2635_v43 }
 0x337   :  { %1831 = vst [vmem:[#allocation8 + $0x20] sm:$0xff] %v1823_v61  ;;  %v1825_v42 = vmax.f32 %v1817_v41, 0.0 }
 0x338   :  { %1832 = vst [vmem:[#allocation8 + $0x28] sm:$0xff] %v1824_v57  ;;  %v1826_v9 = vmax.f32 %v1818_v6, 0.0 }
 0x339   :  { %1833 = vst [vmem:[#allocation8 + $0x30] sm:$0xff] %v1825_v42 }
 0x33a   :  { %1834 = vst [vmem:[#allocation8 + $0x38] sm:$0xff] %v1826_v9 }
 0x33b   :  { %2507 = shalt.err (!%p2504_p0)
}
 0x33c   :  { %s2508_s10 = scalar_lea.hbm %s2934_s5, 1024 }
 0x33d   :  { %p2509_p1 = scmp.ne.s32.totalorder %s2934_s5, %s2508_s10  ;;  %p2512_p2 = scmp.lt.u32.totalorder %s2508_s10, %s2934_s5 }
 0x33f   :  { %p2514_p3 = pnand %p2512_p2, %p2509_p1 }
 0x341   :  { %2517 = shalt.err (!%p2514_p3)
}
 0x342   :  { %s2531_s15 = smov 256   ;;  %s2532_s16 = smov 16  }
 0x343   :  { %1846 = dma.vmem_to_hbm [thread:$0]  %s1841_s6, 1024, %s2934_s5, [#allocation4], %s2531_s15, %s2531_s15, %s2532_s16  }
 0x344   :  { %2522 = dma.done.wait [#allocation4], 1024  }
 0x345   :  { %2523 = vsyncadd [#allocation4], 4294966272 }
 0x346   :  { %1850 = vsyncpa [#allocation3], 1 }
 0x347   :  { %1851 = vsyncpa [#allocation6], 1 }
 0x348   :  { %1852 = vsyncpa [#allocation4], 1 }

</bundles_post_ra>
